<compile_context>
chip_gen: v5e
topology: v5e:2x2
jax: 0.10.0
libtpu: 0.0.40
codegen_flags: <defaults>
</compile_context>

<pallas_src>
import jax
import jax.numpy as jnp
from jax.experimental import pallas as pl
from jax.experimental.pallas import tpu as pltpu

ALPHA = 2.0
BETA = 1.0
LOSS_WEIGHT = 1.0

LANE = 128
MAX_BLOCK_ROWS = 2048   # (2048,128) f32 = 1 MiB per input block
NUM_CORE_SPLITS = 2     # leading 'parallel' axis for v7x megacore; no-op on 1-TC chips


def _make_kernel(rows, block_rows, blocks_per_split):
    """rows/block_rows/blocks_per_split are trace-time Python ints (closed over)."""

    def kernel(pred_ref, target_ref, out_ref):
        c = pl.program_id(0)   # core split ('parallel')
        i = pl.program_id(1)   # streaming / reduction axis ('arbitrary')

        @pl.when(i == 0)
        def _():
            out_ref[...] = jnp.zeros_like(out_ref)

        p = pred_ref[...].astype(jnp.float32)
        t = target_ref[...].astype(jnp.float32)

        # weight = exp(-beta * (t - 1)^2); alpha & loss_weight are folded into the
        # single final scalar multiply in the wrapper.  exp rides on the EUP slot.
        w = jnp.exp(-BETA * (t - 1.0) ** 2)
        l = (p - t) ** 2 * w

        # Mask rows past the logical end of the array: the Pallas-padded boundary
        # block and the clamped duplicate blocks from the core split contain
        # undefined data there; jnp.where selects 0.0 so garbage never propagates.
        row_start = (c * blocks_per_split + i) * block_rows
        row_ids = row_start + jax.lax.broadcasted_iota(jnp.int32, l.shape, 0)
        l = jnp.where(row_ids < rows, l, 0.0)

        # Per-step partial sums stay vreg-shaped (8, 128): pure VPU adds, no
        # cross-lane XLU reduce and no scalar loop-carried dependency.
        out_ref[...] += jnp.sum(l.reshape(-1, 8, LANE), axis=0)

    return kernel


def weight_exp_loss(pred, target, reduction="mean"):
    """JAX/Pallas equivalent of WeightEXPLoss.forward (weight=None, avg_factor=None)."""
    assert pred.shape == target.shape
    assert reduction in ("mean", "sum")
    # TODO(synk): reduction='none' (per-element output) and explicit avg_factor override
    #             are not implemented; defaults of the module are 'mean' / None.

    n_elems = int(pred.size)

    flat_pred = pred.reshape(-1)
    flat_target = target.reshape(-1)

    # Native sublane quantum for the input dtype (rows of 128 lanes per tile).
    itemsize = jnp.dtype(pred.dtype).itemsize
    sub_q = {4: 8, 2: 16, 1: 32}.get(itemsize, 8)
    granule = sub_q * LANE

    padded = pl.cdiv(n_elems, granule) * granule
    if padded != n_elems:
        # Only the sub-tile ragged tail is padded (< granule elements); zeros in both
        # pred and target contribute exactly 0 to the weighted-SE sum.
        flat_pred = jnp.pad(flat_pred, (0, padded - n_elems))
        flat_target = jnp.pad(flat_target, (0, padded - n_elems))

    rows = padded // LANE
    pred2d = flat_pred.reshape(rows, LANE)
    target2d = flat_target.reshape(rows, LANE)

    block_rows = min(MAX_BLOCK_ROWS, rows)          # multiple of sub_q by construction
    num_blocks = pl.cdiv(rows, block_rows)
    num_splits = NUM_CORE_SPLITS if num_blocks >= NUM_CORE_SPLITS else 1
    blocks_per_split = pl.cdiv(num_blocks, num_splits)

    def in_map(c, i):
        # Clamp so every DMA targets a valid block; duplicated / boundary rows are
        # zeroed by the in-kernel row mask.
        return (jnp.minimum(c * blocks_per_split + i, num_blocks - 1), 0)

    partial = pl.pallas_call(
        _make_kernel(rows, block_rows, blocks_per_split),
        out_shape=jax.ShapeDtypeStruct((num_splits * 8, LANE), jnp.float32),
        grid=(num_splits, blocks_per_split),
        in_specs=[
            pl.BlockSpec((block_rows, LANE), in_map),
            pl.BlockSpec((block_rows, LANE), in_map),
        ],
        out_specs=pl.BlockSpec((8, LANE), lambda c, i: (c, 0)),
        compiler_params=pltpu.CompilerParams(
            dimension_semantics=("parallel", "arbitrary"),
        ),
    )(pred2d, target2d)

    total = jnp.sum(partial)
    if reduction == "mean":
        total = total / jnp.float32(n_elems)
    # alpha and loss_weight folded into one scalar multiply.
    return (LOSS_WEIGHT * ALPHA) * total


def _reference(pred, target, reduction="mean"):
    t = target.astype(jnp.float32)
    p = pred.astype(jnp.float32)
    w = ALPHA * jnp.exp(-BETA * (t - 1.0) ** 2)
    l = (p - t) ** 2 * w
    if reduction == "mean":
        return LOSS_WEIGHT * jnp.mean(l)
    return LOSS_WEIGHT * jnp.sum(l)


def _check(shape, key, reduction="mean"):
    k1, k2 = jax.random.split(key)
    pred = jax.random.normal(k1, shape, dtype=jnp.float32)
    target = jax.random.normal(k2, shape, dtype=jnp.float32)
    out = jax.block_until_ready(weight_exp_loss(pred, target, reduction=reduction))
    ref = _reference(pred, target, reduction=reduction)
    assert jnp.allclose(out, ref, rtol=1e-4, atol=1e-6), (shape, reduction, out, ref)


if __name__ == "__main__":
    key = jax.random.PRNGKey(0)
    keys = jax.random.split(key, 3)

    # Primary small NCHW case (single block, exact tiling).
    _check((2, 4, 16, 16), keys[0], reduction="mean")
    # Ragged size (not a multiple of the native tile -> small pad + in-kernel mask).
    _check((2, 3, 7, 13), keys[1], reduction="mean")
    # Multi-block case exercising the 2-way core split, block clamp and boundary mask.
    _check((4, 8, 96, 96), keys[2], reduction="sum")

    print("KERNEL_OK")
</pallas_src>

<mosaic_0001>
module attributes {stable_mosaic.version = 11 : i64} {
  func.func @kernel(%arg0: i32, %arg1: i32, %arg2: memref<16x128xf32, #tpu.memory_space<vmem>>, %arg3: memref<16x128xf32, #tpu.memory_space<vmem>>, %arg4: memref<8x128xf32, #tpu.memory_space<vmem>>) attributes {dimension_semantics = [#tpu.dimension_semantics<parallel>, #tpu.dimension_semantics<arbitrary>], iteration_bounds = array<i64: 1, 1>, scalar_prefetch = 0 : i64, scratch_operands = 0 : i64, tpu.core_type = #tpu.core_type<tc>, window_params = [{transform_indices = @transform_0, window_bounds = array<i64: 16, 128>}, {transform_indices = @transform_1, window_bounds = array<i64: 16, 128>}, {transform_indices = @transform_2, window_bounds = array<i64: 8, 128>}]} {
    %c0_i32 = arith.constant 0 : i32
    %0 = arith.cmpi eq, %arg1, %c0_i32 : i32
    %1 = arith.extui %0 : i1 to i32
    %c0_i32_0 = arith.constant 0 : i32
    %2 = arith.cmpi ne, %1, %c0_i32_0 : i32
    scf.if %2 {
      %cst_12 = arith.constant 0.000000e+00 : f32
      %29 = vector.broadcast %cst_12 : f32 to vector<8x128xf32>
      %c0_13 = arith.constant 0 : index
      %c0_14 = arith.constant 0 : index
      %30 = vector.load %arg4[%c0_13, %c0_14] : memref<8x128xf32, #tpu.memory_space<vmem>>, vector<8x128xf32>
      tpu.vector_store %arg4[%c0_13, %c0_14], %29 {strides = array<i32>} : memref<8x128xf32, #tpu.memory_space<vmem>>, vector<8x128xf32>,
    } else {
    }
    %c0 = arith.constant 0 : index
    %c0_1 = arith.constant 0 : index
    %3 = vector.load %arg2[%c0, %c0_1] : memref<16x128xf32, #tpu.memory_space<vmem>>, vector<16x128xf32>
    %c0_2 = arith.constant 0 : index
    %c0_3 = arith.constant 0 : index
    %4 = vector.load %arg3[%c0_2, %c0_3] : memref<16x128xf32, #tpu.memory_space<vmem>>, vector<16x128xf32>
    %cst = arith.constant 1.000000e+00 : f32
    %5 = vector.broadcast %cst : f32 to vector<16x128xf32>
    %6 = arith.subf %4, %5 : vector<16x128xf32>
    %7 = arith.mulf %6, %6 : vector<16x128xf32>
    %cst_4 = arith.constant -1.000000e+00 : f32
    %8 = vector.broadcast %cst_4 : f32 to vector<16x128xf32>
    %9 = arith.mulf %8, %7 : vector<16x128xf32>
    %10 = math.exp %9 : vector<16x128xf32>
    %11 = arith.subf %3, %4 : vector<16x128xf32>
    %12 = arith.mulf %11, %11 : vector<16x128xf32>
    %13 = arith.mulf %12, %10 : vector<16x128xf32>
    %c1_i32 = arith.constant 1 : i32
    %14 = arith.muli %arg0, %c1_i32 : i32
    %15 = arith.addi %14, %arg1 : i32
    %c16_i32 = arith.constant 16 : i32
    %16 = arith.muli %15, %c16_i32 : i32
    %17 = tpu.iota {dimensions = array<i32: 0>} : vector<16x128xi32>
    %18 = vector.broadcast %16 : i32 to vector<16x128xi32>
    %19 = arith.addi %18, %17 : vector<16x128xi32>
    %c16_i32_5 = arith.constant 16 : i32
    %20 = vector.broadcast %c16_i32_5 : i32 to vector<16x128xi32>
    %21 = arith.cmpi slt, %19, %20 : vector<16x128xi32>
    %cst_6 = arith.constant 0.000000e+00 : f32
    %22 = vector.broadcast %cst_6 : f32 to vector<16x128xf32>
    %23 = arith.select %21, %13, %22 : vector<16x128xi1>, vector<16x128xf32>
    %c0_7 = arith.constant 0 : index
    %c0_8 = arith.constant 0 : index
    %24 = vector.load %arg4[%c0_7, %c0_8] : memref<8x128xf32, #tpu.memory_space<vmem>>, vector<8x128xf32>
    %25 = vector.shape_cast %23 : vector<16x128xf32> to vector<2x8x128xf32>
    %cst_9 = arith.constant dense<0.000000e+00> : vector<8x128xf32>
    %26 = vector.multi_reduction <add>, %25, %cst_9 [0] : vector<2x8x128xf32> to vector<8x128xf32>
    %27 = arith.addf %24, %26 : vector<8x128xf32>
    %c0_10 = arith.constant 0 : index
    %c0_11 = arith.constant 0 : index
    %28 = vector.load %arg4[%c0_10, %c0_11] : memref<8x128xf32, #tpu.memory_space<vmem>>, vector<8x128xf32>
    tpu.vector_store %arg4[%c0_10, %c0_11], %27 {strides = array<i32>} : memref<8x128xf32, #tpu.memory_space<vmem>>, vector<8x128xf32>,
    return
  }
  func.func @transform_0(%arg0: i32, %arg1: i32) -> (i32, i32) {
    %c1_i32 = arith.constant 1 : i32
    %0 = arith.muli %arg0, %c1_i32 : i32
    %1 = arith.addi %0, %arg1 : i32
    %c0_i32 = arith.constant 0 : i32
    %2 = arith.minsi %1, %c0_i32 : i32
    %c0_i32_0 = arith.constant 0 : i32
    %c0_i32_1 = arith.constant 0 : i32
    return %2, %c0_i32_0 : i32, i32
  }
  func.func @transform_1(%arg0: i32, %arg1: i32) -> (i32, i32) {
    %c1_i32 = arith.constant 1 : i32
    %0 = arith.muli %arg0, %c1_i32 : i32
    %1 = arith.addi %0, %arg1 : i32
    %c0_i32 = arith.constant 0 : i32
    %2 = arith.minsi %1, %c0_i32 : i32
    %c0_i32_0 = arith.constant 0 : i32
    %c0_i32_1 = arith.constant 0 : i32
    return %2, %c0_i32_0 : i32, i32
  }
  func.func @transform_2(%arg0: i32, %arg1: i32) -> (i32, i32) {
    %c0_i32 = arith.constant 0 : i32
    %c0_i32_0 = arith.constant 0 : i32
    return %arg0, %c0_i32 : i32, i32
  }
}

</mosaic_0001>

<bundles_post_ra>
// kernel: tpu_custom_call.1
= control target key start
LH: loop header
LB: loop body
LE: loop exit
PB: predicated region body
PF: predicated region fallthrough
CT: control target
= control target key end

     0   :  { %7 = vsyncpa [#allocation3], 0  ;;  %s246_s0 = inlined_call_operand.hbm [shape: f32[16,128], index: 0, kind: input, shape index: {}]   ;;  %s247_s1 = inlined_call_operand.hbm [shape: f32[16,128], index: 1, kind: input, shape index: {}]   ;;  %s248_s2 = inlined_call_operand.hbm [shape: f32[8,128], index: 2, kind: output, shape index: {}]  }
   0x1   :  { %8 = vsyncpa [#allocation6], 0 }
   0x2   :  { %9 = vsyncpa [#allocation4], 0  ;;  %s20_s11 = sshll.u32 %s246_s0, 4  ;;  %s217_s12 = smov [#allocation2]   ;;  %s21_s11 = int_to_ptr.hbm [resolvable:$true] %s20_s11 }
   0x3   :  { %s22_s13 = sshll.u32 %s217_s12, 4  ;;  %s39_s16 = sshll.u32 %s247_s1, 4  ;;  %s23_s13 = int_to_ptr.vmem [resolvable:$true] %s22_s13  ;;  %s40_s16 = int_to_ptr.hbm [resolvable:$true] %s39_s16 }
   0x4   :  { %s218_s17 = smov 128   ;;  %s219_s18 = smov 8  }
   0x5   :  { %28 = dma.hbm_to_vmem [thread:$0]  %s21_s11, 256, %s23_s13, [#allocation3], %s218_s17, %s218_s17, %s219_s18  }
   0x6   :  { %s220_s19 = smov [#allocation5]  }
   0x7   :  { %s41_s20 = sshll.u32 %s220_s19, 4  ;;  %s42_s20 = int_to_ptr.vmem [resolvable:$true] %s41_s20 }
   0x8   :  { %47 = dma.hbm_to_vmem [thread:$0]  %s40_s16, 256, %s42_s20, [#allocation6], %s218_s17, %s218_s17, %s219_s18  }
   0x9   :  { %211 = dma.done.wait [#allocation3], 256  }
   0xa   :  { %212 = vsyncadd [#allocation3], 4294967040 }
   0xb   :  { %213 = dma.done.wait [#allocation6], 256  }
   0xc   :  { %214 = vsyncadd [#allocation6], 4294967040  ;;  %v71_v0 = vld [vmem:[#allocation5] sm:$0xff]  ;;  %v72_v1 = vld [vmem:[#allocation5 + $0x8] sm:$0xff]  ;;  %s221_s0 = smov [#allocation7]   ;;  %s112_s23 = sshll.u32 %s248_s2, 4  ;;  %s113_s23 = int_to_ptr.hbm [resolvable:$true] %s112_s23 }
   0xd   :  { %v127_v2 = vadd.f32 -1.0, %v71_v0  ;;  %v128_v3 = vadd.f32 -1.0, %v72_v1  ;;  %v69_v6 = vld [vmem:[#allocation2] sm:$0xff]  ;;  %v70_v8 = vld [vmem:[#allocation2 + $0x8] sm:$0xff]  ;;  %s110_s1 = sshll.u32 %s221_s0, 4  ;;  %s111_s1 = int_to_ptr.vmem [resolvable:$true] %s110_s1 }
   0xe   :  { %v83_v12 = vsub.f32 %v69_v6, %v71_v0  ;;  %v84_v13 = vsub.f32 %v70_v8, %v72_v1 }
   0xf   :  { %v75_v4 = vmul.f32 %v127_v2, %v127_v2  ;;  %v76_v5 = vmul.f32 %v128_v3, %v128_v3 }
  0x10   :  { %v85_v14 = vmul.f32 %v83_v12, %v83_v12  ;;  %v86_v15 = vmul.f32 %v84_v13, %v84_v13 }
  0x11   :  { %v77_v7 = vmul.f32 -1.0, %v75_v4  ;;  %v78_v9 = vmul.f32 -1.0, %v76_v5 }
  0x13   :  { %v79_v10 = vmul.f32 1.442695, %v77_v7  ;;  %v81_v11 = vmul.f32 1.442695, %v78_v9 }
  0x15   :  { %135 = vpow2.f32 %v79_v10 }
  0x16   :  { %137 = vpow2.f32 %v81_v11 }
  0x1b   :  { %v136_v16 = vpop.eup %135 }
  0x1c   :  { %v138_v17 = vpop.eup %137  ;;  %v87_v18 = vmul.f32 %v136_v16, %v85_v14 }
  0x1d   :  { %v88_v19 = vmul.f32 %v138_v17, %v86_v15 }
  0x1f   :  { %v102_v20 = vadd.f32 %v88_v19, %v87_v18 }
  0x21   :  { %104 = vst [vmem:[#allocation7] sm:$0xff] %v102_v20 }
  0x22   :  { %115 = dma.vmem_to_hbm [thread:$0]  %s111_s1, 128, %s113_s23, [#allocation4]  }
  0x23   :  { %215 = dma.done.wait [#allocation4], 128  }
  0x24   :  { %216 = vsyncadd [#allocation4], 4294967168 }
  0x25   :  { %120 = vsyncpa [#allocation3], 1 }
  0x26   :  { %121 = vsyncpa [#allocation6], 1 }
  0x27   :  { %122 = vsyncpa [#allocation4], 1 }

</bundles_post_ra>
